<compile_context>
chip_gen: v7x
topology: tpu7x:2x2x1
jax: 0.10.0
libtpu: 0.0.40
codegen_flags: <defaults>
</compile_context>

<pallas_src>
import jax
import jax.numpy as jnp
from jax import lax
from jax.experimental import pallas as pl
from jax.experimental.pallas import tpu as pltpu


def _make_kernel(n_total: int, tn: int):
    """Kernel with static batch size / tile lane count baked in."""
    inv_n = 1.0 / float(n_total)
    has_tail = (n_total % tn) != 0

    def kernel(logits_ref, target_ref, out_ref, nll_acc, cnt_acc):
        # logits_ref: (TN, C) producer dtype, native row-major (contiguous HBM block)
        # target_ref: (1, TN) int32
        # out_ref   : (1,)    f32 SMEM
        # nll_acc   : (1, TN) f32 VMEM per-lane partial sums of per-sample NLL
        # cnt_acc   : (1, TN) f32 VMEM per-lane partial counts of target == 9
        pid = pl.program_id(0)
        last = pl.num_programs(0) - 1

        @pl.when(pid == 0)
        def _init():
            nll_acc[...] = jnp.zeros_like(nll_acc)
            cnt_acc[...] = jnp.zeros_like(cnt_acc)

        # In-kernel class-major swizzle (XLU): batch lands on the 128-lane axis,
        # class reductions become shallow sublane reductions.
        logits = jnp.transpose(logits_ref[...].astype(jnp.float32))    # (C, TN)
        tgt = target_ref[...]                                           # (1, TN)

        # Numerically stable log-sum-exp over the class (sublane) axis.
        m = jnp.max(logits, axis=0, keepdims=True)                      # (1, TN)
        lse = m + jnp.log(jnp.sum(jnp.exp(logits - m), axis=0, keepdims=True))

        # Target-class logit via one-hot compare/select (no dynamic gather on TPU).
        row_ids = lax.broadcasted_iota(jnp.int32, logits.shape, 0)      # (C, TN)
        tgt_logit = jnp.sum(jnp.where(row_ids == tgt, logits, 0.0),
                            axis=0, keepdims=True)                      # (1, TN)

        per = lse - tgt_logit                                           # -log p[target]
        is9 = (tgt == 9).astype(jnp.float32)                            # (1, TN)

        if has_tail:
            # Mask padded lanes only on the last (partial) tile; all other tiles
            # accumulate without the iota/compare/select overhead.
            @pl.when(pid < last)
            def _accum_body():
                nll_acc[...] += per
                cnt_acc[...] += is9

            @pl.when(pid == last)
            def _accum_tail():
                lane = lax.broadcasted_iota(jnp.int32, (1, tn), 1)
                valid = (pid * tn + lane) < n_total
                # Keep as a select: padded lanes may hold NaN/Inf garbage.
                nll_acc[...] += jnp.where(valid, per, 0.0)
                cnt_acc[...] += jnp.where(valid, is9, 0.0)
        else:
            nll_acc[...] += per
            cnt_acc[...] += is9

        @pl.when(pid == last)
        def _finalize():
            s = jnp.sum(nll_acc[...])
            c9 = jnp.sum(cnt_acc[...])
            # loss * (1 + fraction(target == 9)); 1/N is a static constant.
            out_ref[0] = s * inv_n * (1.0 + c9 * inv_n)

    return kernel


def _choose_tile(n: int, c: int, itemsize: int,
                 target_block_bytes: int = 2 * 1024 * 1024,
                 max_lanes: int = 32768) -> int:
    """Batch (lane) tile size. Full-extent single block when the whole batch fits
    under the per-block byte target; otherwise a large multiple of 128 so each grid
    step moves MiB-scale contiguous DMAs (~85%+ of HBM roofline) instead of ~40 KB."""
    per_row = c * itemsize + 4              # one logits row + one int32 target
    cap = target_block_bytes // max(per_row, 1)
    cap = max(1024, min((cap // 128) * 128, max_lanes))
    if n <= cap:
        return n                            # single full-extent block is always legal
    return cap                              # multiple of 128 -> legal partial tiling


def custom_loss(output, target, tile_n=None):
    """output: [N, C] float logits (any float dtype); target: [N] int class indices."""
    n, c = output.shape
    itemsize = jnp.dtype(output.dtype).itemsize

    tgt = target.astype(jnp.int32).reshape(1, n)            # free metadata reshape

    tn = tile_n if tile_n is not None else _choose_tile(n, c, itemsize)
    grid = (pl.cdiv(n, tn),)

    cost = pl.CostEstimate(
        flops=6 * n * c,
        transcendentals=n * (c + 1),
        bytes_accessed=n * c * itemsize + n * 4 + 4,
    )

    # VMEM budget from the actual block bytes: double-buffered inputs + f32
    # transposed tile / elementwise temps + per-lane accumulators + headroom.
    c_pad = ((c + 7) // 8) * 8
    block_in_bytes = tn * (c * itemsize + 4)
    work_bytes = 10 * c_pad * tn * 4 + 4 * tn * 4
    vmem_limit = int(min(56 << 20, max(4 << 20,
                                       2 * block_in_bytes + work_bytes + (1 << 20))))

    # TODO(synk): v7x dual-TC split (leading "parallel" axis with per-core partial
    # [sum_nll, count9]) and fusing this epilogue into the producer matmul are
    # skipped -- at DARTS-scale N the op is launch/DMA-latency bound anyway.
    out = pl.pallas_call(
        _make_kernel(n, tn),
        out_shape=jax.ShapeDtypeStruct((1,), jnp.float32),
        grid_spec=pltpu.PrefetchScalarGridSpec(
            num_scalar_prefetch=0,
            grid=grid,
            in_specs=[
                pl.BlockSpec((tn, c), lambda i: (i, 0)),   # contiguous (TN, C) rows
                pl.BlockSpec((1, tn), lambda i: (0, i)),
            ],
            out_specs=pl.BlockSpec(memory_space=pltpu.MemorySpace.SMEM),
            scratch_shapes=[pltpu.VMEM((1, tn), jnp.float32),
                            pltpu.VMEM((1, tn), jnp.float32)],
        ),
        compiler_params=pltpu.CompilerParams(
            dimension_semantics=("arbitrary",),            # batch axis is a reduction
            vmem_limit_bytes=vmem_limit,
        ),
        cost_estimate=cost,
    )(output, tgt)
    return out[0]


def _reference(output, target):
    # Pure-JAX reference for sanity checking.
    logp = jax.nn.log_softmax(output.astype(jnp.float32), axis=-1)
    per = -jnp.take_along_axis(logp, target.astype(jnp.int32)[:, None], axis=-1)[:, 0]
    loss = jnp.mean(per)
    high_cost = jnp.mean(loss * (target == 9).astype(jnp.float32))
    return loss + high_cost


if __name__ == "__main__":
    key = jax.random.PRNGKey(0)
    k1, k2, k3, k4 = jax.random.split(key, 4)

    # Small shapes implied by the module: batch of 8, 10 classes (mask uses class 9).
    N, C = 8, 10
    logits = jax.random.normal(k1, (N, C), dtype=jnp.float32)
    target = jax.random.randint(k2, (N,), 0, C, dtype=jnp.int32)

    result = custom_loss(logits, target)
    jax.block_until_ready(result)
    ref = _reference(logits, target)
    assert jnp.allclose(result, ref, atol=1e-5, rtol=1e-5), (result, ref)

    # Exercise the tiled + masked-tail path (grid of 2, partial last tile).
    N2 = 200
    logits2 = jax.random.normal(k3, (N2, C), dtype=jnp.float32)
    target2 = jax.random.randint(k4, (N2,), 0, C, dtype=jnp.int32)
    result2 = custom_loss(logits2, target2, tile_n=128)
    jax.block_until_ready(result2)
    ref2 = _reference(logits2, target2)
    assert jnp.allclose(result2, ref2, atol=1e-5, rtol=1e-5), (result2, ref2)

    print("KERNEL_OK")
</pallas_src>

<mosaic_0001>
module attributes {stable_mosaic.version = 11 : i64} {
  func.func @kernel(%arg0: i32, %arg1: memref<8x10xf32, #tpu.memory_space<vmem>>, %arg2: memref<1x8xi32, #tpu.memory_space<vmem>>, %arg3: memref<1xf32, #tpu.memory_space<smem>>, %arg4: memref<1x8xf32, #tpu.memory_space<vmem>>, %arg5: memref<1x8xf32, #tpu.memory_space<vmem>>) attributes {dimension_semantics = [#tpu.dimension_semantics<arbitrary>], iteration_bounds = array<i64: 1>, scalar_prefetch = 0 : i64, scratch_operands = 2 : i64, tpu.core_type = #tpu.core_type<tc>, window_params = [{transform_indices = @transform_0, window_bounds = array<i64: 8, 10>}, {transform_indices = @transform_1, window_bounds = array<i64: 1, 8>}, {transform_indices = @transform_2, window_bounds = array<i64: 1>}]} {
    %c0_i32 = arith.constant 0 : i32
    %0 = arith.cmpi eq, %arg0, %c0_i32 : i32
    %1 = arith.extui %0 : i1 to i32
    %c0_i32_0 = arith.constant 0 : i32
    %2 = arith.cmpi ne, %1, %c0_i32_0 : i32
    scf.if %2 {
      %cst_17 = arith.constant 0.000000e+00 : f32
      %36 = vector.broadcast %cst_17 : f32 to vector<1x8xf32>
      %c0_18 = arith.constant 0 : index
      %c0_19 = arith.constant 0 : index
      %37 = vector.load %arg4[%c0_18, %c0_19] : memref<1x8xf32, #tpu.memory_space<vmem>>, vector<1x8xf32>
      tpu.vector_store %arg4[%c0_18, %c0_19], %36 {strides = array<i32>} : memref<1x8xf32, #tpu.memory_space<vmem>>, vector<1x8xf32>,
      %cst_20 = arith.constant 0.000000e+00 : f32
      %38 = vector.broadcast %cst_20 : f32 to vector<1x8xf32>
      %c0_21 = arith.constant 0 : index
      %c0_22 = arith.constant 0 : index
      %39 = vector.load %arg5[%c0_21, %c0_22] : memref<1x8xf32, #tpu.memory_space<vmem>>, vector<1x8xf32>
      tpu.vector_store %arg5[%c0_21, %c0_22], %38 {strides = array<i32>} : memref<1x8xf32, #tpu.memory_space<vmem>>, vector<1x8xf32>,
    } else {
    }
    %c0 = arith.constant 0 : index
    %c0_1 = arith.constant 0 : index
    %3 = vector.load %arg1[%c0, %c0_1] : memref<8x10xf32, #tpu.memory_space<vmem>>, vector<8x10xf32>
    %4 = tpu.transpose %3, [1, 0] : vector<8x10xf32> -> vector<10x8xf32>
    %c0_2 = arith.constant 0 : index
    %c0_3 = arith.constant 0 : index
    %5 = vector.load %arg2[%c0_2, %c0_3] : memref<1x8xi32, #tpu.memory_space<vmem>>, vector<1x8xi32>
    %cst = arith.constant dense<0xFF800000> : vector<8xf32>
    %6 = vector.multi_reduction <maximumf>, %4, %cst [0] : vector<10x8xf32> to vector<8xf32>
    %7 = vector.shape_cast %6 : vector<8xf32> to vector<1x8xf32>
    %8 = vector.broadcast %7 : vector<1x8xf32> to vector<10x8xf32>
    %9 = arith.subf %4, %8 : vector<10x8xf32>
    %10 = math.exp %9 : vector<10x8xf32>
    %cst_4 = arith.constant dense<0.000000e+00> : vector<8xf32>
    %11 = vector.multi_reduction <add>, %10, %cst_4 [0] : vector<10x8xf32> to vector<8xf32>
    %12 = vector.shape_cast %11 : vector<8xf32> to vector<1x8xf32>
    %13 = math.log %12 : vector<1x8xf32>
    %14 = arith.addf %7, %13 : vector<1x8xf32>
    %15 = tpu.iota {dimensions = array<i32: 0>} : vector<10x8xi32>
    %16 = vector.broadcast %5 : vector<1x8xi32> to vector<10x8xi32>
    %17 = arith.cmpi eq, %15, %16 : vector<10x8xi32>
    %cst_5 = arith.constant 0.000000e+00 : f32
    %18 = vector.broadcast %cst_5 : f32 to vector<10x8xf32>
    %19 = arith.select %17, %4, %18 : vector<10x8xi1>, vector<10x8xf32>
    %cst_6 = arith.constant dense<0.000000e+00> : vector<8xf32>
    %20 = vector.multi_reduction <add>, %19, %cst_6 [0] : vector<10x8xf32> to vector<8xf32>
    %21 = vector.shape_cast %20 : vector<8xf32> to vector<1x8xf32>
    %22 = arith.subf %14, %21 : vector<1x8xf32>
    %c9_i32 = arith.constant 9 : i32
    %23 = vector.broadcast %c9_i32 : i32 to vector<1x8xi32>
    %24 = arith.cmpi eq, %5, %23 : vector<1x8xi32>
    %25 = arith.extui %24 : vector<1x8xi1> to vector<1x8xi32>
    %26 = arith.sitofp %25 : vector<1x8xi32> to vector<1x8xf32>
    %c0_7 = arith.constant 0 : index
    %c0_8 = arith.constant 0 : index
    %27 = vector.load %arg4[%c0_7, %c0_8] : memref<1x8xf32, #tpu.memory_space<vmem>>, vector<1x8xf32>
    %28 = arith.addf %27, %22 : vector<1x8xf32>
    %c0_9 = arith.constant 0 : index
    %c0_10 = arith.constant 0 : index
    %29 = vector.load %arg4[%c0_9, %c0_10] : memref<1x8xf32, #tpu.memory_space<vmem>>, vector<1x8xf32>
    tpu.vector_store %arg4[%c0_9, %c0_10], %28 {strides = array<i32>} : memref<1x8xf32, #tpu.memory_space<vmem>>, vector<1x8xf32>,
    %c0_11 = arith.constant 0 : index
    %c0_12 = arith.constant 0 : index
    %30 = vector.load %arg5[%c0_11, %c0_12] : memref<1x8xf32, #tpu.memory_space<vmem>>, vector<1x8xf32>
    %31 = arith.addf %30, %26 : vector<1x8xf32>
    %c0_13 = arith.constant 0 : index
    %c0_14 = arith.constant 0 : index
    %32 = vector.load %arg5[%c0_13, %c0_14] : memref<1x8xf32, #tpu.memory_space<vmem>>, vector<1x8xf32>
    tpu.vector_store %arg5[%c0_13, %c0_14], %31 {strides = array<i32>} : memref<1x8xf32, #tpu.memory_space<vmem>>, vector<1x8xf32>,
    %c0_i32_15 = arith.constant 0 : i32
    %33 = arith.cmpi eq, %arg0, %c0_i32_15 : i32
    %34 = arith.extui %33 : i1 to i32
    %c0_i32_16 = arith.constant 0 : i32
    %35 = arith.cmpi ne, %34, %c0_i32_16 : i32
    scf.if %35 {
      %c0_17 = arith.constant 0 : index
      %c0_18 = arith.constant 0 : index
      %36 = vector.load %arg4[%c0_17, %c0_18] : memref<1x8xf32, #tpu.memory_space<vmem>>, vector<1x8xf32>
      %37 = vector.shape_cast %36 : vector<1x8xf32> to vector<1x1x8xf32>
      %cst_19 = arith.constant dense<0.000000e+00> : vector<1xf32>
      %38 = vector.multi_reduction <add>, %37, %cst_19 [1, 2] : vector<1x1x8xf32> to vector<1xf32>
      %39 = vector.shape_cast %38 : vector<1xf32> to vector<1x1x1xf32>
      %40 = vector.extract %39[0, 0, 0] : f32 from vector<1x1x1xf32>
      %c0_20 = arith.constant 0 : index
      %c0_21 = arith.constant 0 : index
      %41 = vector.load %arg5[%c0_20, %c0_21] : memref<1x8xf32, #tpu.memory_space<vmem>>, vector<1x8xf32>
      %42 = vector.shape_cast %41 : vector<1x8xf32> to vector<1x1x8xf32>
      %cst_22 = arith.constant dense<0.000000e+00> : vector<1xf32>
      %43 = vector.multi_reduction <add>, %42, %cst_22 [1, 2] : vector<1x1x8xf32> to vector<1xf32>
      %44 = vector.shape_cast %43 : vector<1xf32> to vector<1x1x1xf32>
      %45 = vector.extract %44[0, 0, 0] : f32 from vector<1x1x1xf32>
      %cst_23 = arith.constant 1.250000e-01 : f32
      %46 = arith.mulf %40, %cst_23 : f32
      %cst_24 = arith.constant 1.250000e-01 : f32
      %47 = arith.mulf %45, %cst_24 : f32
      %cst_25 = arith.constant 1.000000e+00 : f32
      %48 = arith.addf %cst_25, %47 : f32
      %49 = arith.mulf %46, %48 : f32
      %c0_26 = arith.constant 0 : index
      %50 = memref.load %arg3[%c0_26] : memref<1xf32, #tpu.memory_space<smem>>
      memref.store %49, %arg3[%c0_26] : memref<1xf32, #tpu.memory_space<smem>>
    } else {
    }
    return
  }
  func.func @transform_0(%arg0: i32) -> (i32, i32) {
    %c0_i32 = arith.constant 0 : i32
    %c0_i32_0 = arith.constant 0 : i32
    return %arg0, %c0_i32 : i32, i32
  }
  func.func @transform_1(%arg0: i32) -> (i32, i32) {
    %c0_i32 = arith.constant 0 : i32
    %c0_i32_0 = arith.constant 0 : i32
    return %c0_i32, %arg0 : i32, i32
  }
  func.func @transform_2(%arg0: i32) -> i32 {
    %c0_i32 = arith.constant 0 : i32
    %c0_i32_0 = arith.constant 0 : i32
    return %c0_i32 : i32
  }
}

</mosaic_0001>

<bundles_post_ra>
// kernel: tpu_custom_call.1
= control target key start
LH: loop header
LB: loop body
LE: loop exit
PB: predicated region body
PF: predicated region fallthrough
CT: control target
= control target key end

     0   :  { %7 = vsyncpa [#allocation5], 0  ;;  %s277_s0 = inlined_call_operand.hbm [shape: f32[8,10], index: 0, kind: input, shape index: {}]   ;;  %s278_s1 = inlined_call_operand.vmem [shape: s32[1,8], index: 1, kind: input, shape index: {}]   ;;  %s279_s2 = inlined_call_operand.hbm [shape: f32[1], index: 2, kind: output, shape index: {}]  }
   0x1   :  { %8 = vsyncpa [#allocation6], 0  ;;  %s220_s9 = smov [#allocation4]   ;;  %s184_s13 = scalar_lea.hbm %s277_s0, 128 }
   0x2   :  { %s15_s10 = sshll.u32 %s220_s9, 4  ;;  %p185_p0 = scmp.ne.s32.totalorder %s277_s0, %s184_s13  ;;  %s16_s10 = int_to_ptr.vmem [resolvable:$true] %s15_s10 }
   0x3   :  { %p188_p1 = scmp.lt.u32.totalorder %s184_s13, %s277_s0 }
   0x5   :  { %p190_p2 = pnand %p188_p1, %p185_p0 }
   0x7   :  { %193 = shalt.err (!%p190_p2)
}
   0x8   :  { %s194_s18 = scalar_lea.vmem %s16_s10, 128  ;;  %p199_p4 = scmp.lt.s32.totalorder %s16_s10, %s16_s10 }
   0x9   :  { %p195_p3 = scmp.ne.s32.totalorder %s16_s10, %s194_s18  ;;  %p200_p5 = scmp.lt.s32.totalorder %s194_s18, %s194_s18 }
   0xb   :  { %p201_p6 = por %p200_p5, %p199_p4 }
   0xd   :  { %p202_p7 = pnand %p201_p6, %p195_p3 }
   0xf   :  { %205 = shalt.err (!%p202_p7)
}
  0x10   :  { %18 = dma.hbm_to_vmem [thread:$0]  %s277_s0, 128, %s16_s10, [#allocation5]  }
  0x11   :  { %216 = dma.done.wait [#allocation5], 128  }
  0x12   :  { %217 = vsyncadd [#allocation5], 4294967168  ;;  %v31_v0 = vld [vmem:[#allocation4] sm:$0xff]  ;;  %vm28_vm0 = vcmask 57344   ;;  %v221_v1 = vmov 0.0   ;;  %vm65_vm2 = vcmask 64512   ;;  %v94_v18 = vlaneseq }
  0x13   :  { %32 = vxpose.xlu0.b32.start.end [1/1] (short) (narrow) %v31_v0, 16  ;;  %30 = vst.msk [vmem:[#allocation3] sm:$0x1] %vm28_vm0, %v221_v1  ;;  %29 = vst.msk [vmem:[#allocation2] sm:$0x1] %vm28_vm0, %v221_v1  ;;  %vm67_vm3 = vcmask 58368  }
  0x14   :  { %v64_v2 = vld [vmem:[%s278_s1] sm:$0x1]  ;;  %v95_v22 = vshrl.u32 %v94_v18, 7  ;;  %s206_s29 = scalar_lea.hbm %s279_s2, 16 }
  0x15   :  { %vm115_vm1 = vcmp.eq.s32.totalorder %v64_v2, 9  ;;  %p207_p8 = scmp.ne.s32.totalorder %s279_s2, %s206_s29  ;;  %p210_p9 = scmp.lt.u32.totalorder %s206_s29, %s279_s2 }
  0x16   :  { %v170_v3 = vsel %vm115_vm1, 1.0, %v221_v1  ;;  %v99_v25 = vsub.s32 0, %v95_v22  ;;  %v96_v26 = vadd.s32 8, %v95_v22 }
  0x17   :  { %p212_p10 = pnand %p210_p9, %p207_p8 }
  0x18   :  { %v100_v27 = vrot.slane %v64_v2, %v99_v25 }
  0x1a   :  { %v122_v4 = vld [vmem:[#allocation3] sm:$0x1]  ;;  %vm102_vm4 = vcmp.eq.s32.totalorder %v96_v26, %v100_v27  ;;  %vm101_vm5 = vcmp.eq.s32.totalorder %v95_v22, %v100_v27  ;;  %v118_v53 = vld [vmem:[#allocation2] sm:$0x1] }
  0x1b   :  { %v123_v5 = vadd.f32 %v170_v3, %v122_v4 }
  0x1d   :  { %124 = vst.msk [vmem:[#allocation3] sm:$0x1] %vm28_vm0, %v123_v5 }
  0x24   :  { %v139_v6 = vld [vmem:[#allocation3] sm:$0x1] }
  0x25   :  { %v140_v7 = vsel %vm28_vm0, %v139_v6, 0.0 }
  0x26   :  { %141 = vadd.xlane.f32.xlu1 %v140_v7 }
  0x93   :  { %v48_v8 = vpop.trf.xlu0 }
  0x94   :  { %v66_v10 = vsel %vm65_vm2, %v48_v8, -inf  ;;  %v103_v32 = vsel %vm101_vm5, %v48_v8, 0.0 }
  0x95   :  { %v105_v36 = vsel %vm65_vm2, %v103_v32, 0.0 }
  0x97   :  { %v49_v9 = vpop.trf.xlu0 }
  0x98   :  { %v68_v11 = vsel %vm67_vm3, %v49_v9, -inf  ;;  %v104_v29 = vsel %vm102_vm4, %v49_v9, 0.0 }
  0x99   :  { %v69_v12 = vmax.f32 %v66_v10, %v68_v11  ;;  %v106_v35 = vsel %vm67_vm3, %v104_v29, 0.0 }
  0x9a   :  { %v107_v38 = vadd.f32 %v106_v35, %v105_v36 }
  0x9b   :  { %v70_v13 = vrot.slane %v69_v12, 4 }
  0x9c   :  { %v108_v41 = vrot.slane %v107_v38, 4 }
  0x9d   :  { %v71_v14 = vmax.f32 %v69_v12, %v70_v13 }
  0x9e   :  { %v109_v44 = vadd.f32 %v108_v41, %v107_v38 }
  0x9f   :  { %v72_v15 = vrot.slane %v71_v14, 2 }
  0xa0   :  { %v110_v46 = vrot.slane %v109_v44, 2 }
  0xa1   :  { %v73_v16 = vmax.f32 %v71_v14, %v72_v15 }
  0xa2   :  { %v111_v47 = vadd.f32 %v110_v46, %v109_v44 }
  0xa3   :  { %v74_v17 = vrot.slane %v73_v16, 1 }
  0xa4   :  { %v112_v48 = vrot.slane %v111_v47, 1 }
  0xa5   :  { %v75_v19 = vmax.f32 %v73_v16, %v74_v17 }
  0xa6   :  { %v113_v52 = vadd.f32 %v112_v48, %v111_v47 }
  0xa7   :  { %v76_v20 = vsub.f32 %v48_v8, %v75_v19  ;;  %v77_v21 = vsub.f32 %v49_v9, %v75_v19 }
  0xa9   :  { %v78_v23 = vmul.f32 1.442695, %v76_v20  ;;  %v80_v24 = vmul.f32 1.442695, %v77_v21 }
  0xab   :  { %178 = vpow2.f32 %v78_v23 }
  0xac   :  { %180 = vpow2.f32 %v80_v24 }
  0xb3   :  { %v142_v58 = vpop.xlane.xlu1 %141 }
  0xb4   :  { %v143_v59 = vrot.slane %v142_v58, 4 }
  0xb5   :  { %v179_v28 = vpop.eup %178 }
  0xb6   :  { %v181_v30 = vpop.eup %180  ;;  %v82_v31 = vsel %vm65_vm2, %v179_v28, 0.0  ;;  %v144_v60 = vadd.f32 %v143_v59, %v142_v58 }
  0xb7   :  { %v83_v33 = vsel %vm67_vm3, %v181_v30, 0.0 }
  0xb8   :  { %v84_v34 = vadd.f32 %v83_v33, %v82_v31  ;;  %v145_v61 = vrot.slane %v144_v60, 2 }
  0xba   :  { %v85_v37 = vrot.slane %v84_v34, 4  ;;  %v146_v1 = vadd.f32 %v145_v61, %v144_v60 }
  0xbc   :  { %v86_v39 = vadd.f32 %v85_v37, %v84_v34  ;;  %v147_v4 = vrot.slane %v146_v1, 1 }
  0xbe   :  { %v87_v40 = vrot.slane %v86_v39, 2  ;;  %v148_v7 = vadd.f32 %v147_v4, %v146_v1 }
  0xc0   :  { %v88_v42 = vadd.f32 %v87_v40, %v86_v39 }
  0xc2   :  { %v89_v43 = vrot.slane %v88_v42, 1 }
  0xc4   :  { %v90_v45 = vadd.f32 %v89_v43, %v88_v42 }
  0xc6   :  { %182 = vlog2.f32 %v90_v45 }
  0xd0   :  { %v183_v49 = vpop.eup %182 }
  0xd1   :  { %v92_v50 = vmul.f32 0.6931472, %v183_v49 }
  0xd3   :  { %v93_v51 = vadd.f32 %v92_v50, %v75_v19 }
  0xd5   :  { %v114_v54 = vsub.f32 %v93_v51, %v113_v52 }
  0xd7   :  { %v119_v55 = vadd.f32 %v118_v53, %v114_v54 }
  0xd9   :  { %121 = vst.msk [vmem:[#allocation2] sm:$0x1] %vm28_vm0, %v119_v55 }
  0xe0   :  { %v128_v56 = vld [vmem:[#allocation2] sm:$0x1] }
  0xe1   :  { %v129_v57 = vsel %vm28_vm0, %v128_v56, 0.0 }
  0xe2   :  { %130 = vadd.xlane.f32.xlu0 %v129_v57 }
 0x16f   :  { %v131_v62 = vpop.xlane.xlu0 %130 }
 0x170   :  { %v132_v63 = vrot.slane %v131_v62, 4 }
 0x172   :  { %v133_v0 = vadd.f32 %v132_v63, %v131_v62 }
 0x174   :  { %v134_v2 = vrot.slane %v133_v0, 2 }
 0x176   :  { %v135_v3 = vadd.f32 %v134_v2, %v133_v0 }
 0x178   :  { %v136_v5 = vrot.slane %v135_v3, 1 }
 0x17a   :  { %v137_v6 = vadd.f32 %v136_v5, %v135_v3 }
 0x17c   :  { %171 = vpush %v137_v6 }
 0x17d   :  { %173 = vpush %v148_v7 }
 0x1ad   :  { %s172_s0 = spop %171 }
 0x1ae   :  { %s174_s1 = spop %173  ;;  %s150_s24 = smul.f32 0.125, %s172_s0 }
 0x1af   :  { %s151_s23 = smul.f32 0.125, %s174_s1 }
 0x1b1   :  { %s152_s25 = sadd.f32 1.0, %s151_s23 }
 0x1b3   :  { %s153_s26 = smul.f32 %s152_s25, %s150_s24 }
 0x1b5   :  { %155 = sst [smem:[#allocation7]] %s153_s26 }
 0x1b6   :  { %215 = shalt.err (!%p212_p10)
}
 0x1b7   :  { %s222_s6 = smov [#allocation7]  }
 0x1b8   :  { %163 = dma.smem_to_hbm %s222_s6, 16, %s279_s2, [#allocation6]  }
 0x1b9   :  { %218 = dma.done.wait [#allocation6], 16  }
 0x1ba   :  { %219 = vsyncadd [#allocation6], 4294967280 }
 0x1bb   :  { %167 = sfence }
 0x1bc   :  { %168 = vsyncpa [#allocation5], 1 }
 0x1bd   :  { %169 = vsyncpa [#allocation6], 1 }

</bundles_post_ra>
